<compile_context>
chip_gen: v7x
topology: tpu7x:2x2x1
jax: 0.10.0
libtpu: 0.0.40
codegen_flags: <defaults>
</compile_context>

<pallas_src>
import functools

import jax
import jax.numpy as jnp
import numpy as np
from jax.experimental import pallas as pl
from jax.experimental.pallas import tpu as pltpu


# ----------------------------- Pallas kernel --------------------------------

def _downc_conv_kernel(xa_ref, xb_ref, wfa_ref, wfb_ref, bf_ref, w2t_ref,
                       b2_ref, o_ref, *, cmid_pad):
    # xa_ref: (1, C1, TS) pooled-x1 tile; xb_ref: (1, C2, TS) x2 tile.
    # wfa/wfb: (Cmid_pad+Cout, C1/C2) stacked [conv1; conv_skip] weights
    #          (BN folded, transposed for channel-first matmul).
    # bf:      (Cmid_pad+Cout, 1) stacked biases.
    # w2t:     (Cout, Cmid_pad), b2: (Cout, 1).
    # o_ref:   (1, Cout, TS)  -- lane-dense output.
    xa = xa_ref[0]                                   # (C1, TS)
    xb = xb_ref[0]                                   # (C2, TS)
    # One fused MXU push per input covers conv1 AND the skip conv.
    z = (jnp.dot(wfa_ref[...], xa, preferred_element_type=jnp.float32)
         + jnp.dot(wfb_ref[...], xb, preferred_element_type=jnp.float32)
         + bf_ref[...])                              # (Cmid_pad+Cout, TS)
    h = jnp.maximum(z[:cmid_pad, :], 0.0)            # conv1 + bn1 + relu
    s = z[cmid_pad:, :]                              # conv_skip + bn_skip
    y = jnp.dot(w2t_ref[...], h, preferred_element_type=jnp.float32) + b2_ref[...]
    y = jnp.maximum(y, 0.0)                          # conv2 + bn2 + relu
    o_ref[0] = (y + s).astype(o_ref.dtype)           # residual add, no relu


# ----------------------------- wrappers --------------------------------------

def fold_bn(w, b, gamma, beta, mean, var, eps=1e-5):
    """Fold conv bias + eval-mode BN into (Cin, Cout) weight and (1, Cout) bias."""
    scale = gamma / jnp.sqrt(var + eps)          # (Cout,)
    w_f = w * scale[None, :]                     # (Cin, Cout)
    b_f = (b - mean) * scale + beta              # (Cout,)
    return w_f, b_f.reshape(1, -1)


@functools.partial(jax.jit, static_argnames=("tile_s",))
def downc_block(x1, x2, params, *, tile_s=8192):
    """x1: (N,C1,D,H,W), x2: (N,C2,D//2,H//2,W//2) -> (N,Cout,D//2,H//2,W//2)."""
    N, C1, D, H, W = x1.shape
    assert D % 2 == 0 and H % 2 == 0 and W % 2 == 0
    Dp, Hp, Wp = D // 2, H // 2, W // 2
    C2 = x2.shape[1]
    S = Dp * Hp * Wp

    # MaxPool3d(2) fused with the flatten to channel-first voxel columns:
    # a single XLA reduce (x1 read once, small pooled tensor written once).
    xa = x1.reshape(N, C1, Dp, 2, Hp, 2, Wp, 2).max(axis=(3, 5, 7))
    xa = xa.reshape(N, C1, S)
    xb = x2.reshape(N, C2, S)

    # Host-side weight prep (tiny): transpose for channel-first matmul, split
    # by input (pooled-x1 channels vs x2 channels) so no concat hits HBM, and
    # stack conv1 + conv_skip so they share one MXU push.  The conv1 block is
    # zero-padded to a multiple of 8 rows so the in-register split of the
    # stacked result is sublane-aligned.
    w1, b1 = params["w1"], params["b1"].reshape(-1)     # (Cin, Cmid), (Cmid,)
    w2, b2 = params["w2"], params["b2"].reshape(-1)     # (Cmid, Cout), (Cout,)
    ws, bs = params["ws"], params["bs"].reshape(-1)     # (Cin, Cout), (Cout,)
    Cin = C1 + C2
    Cmid, Cout = w1.shape[1], w2.shape[1]
    cmid_pad = -(-Cmid // 8) * 8
    pad_rows = cmid_pad - Cmid

    w1t = w1.T                                          # (Cmid, Cin)
    w2t = w2.T                                          # (Cout, Cmid)
    b1p = b1
    if pad_rows:
        w1t = jnp.concatenate(
            [w1t, jnp.zeros((pad_rows, Cin), w1t.dtype)], axis=0)
        b1p = jnp.concatenate([b1, jnp.zeros((pad_rows,), b1.dtype)])
        w2t = jnp.concatenate(
            [w2t, jnp.zeros((Cout, pad_rows), w2t.dtype)], axis=1)

    wst = ws.T                                          # (Cout, Cin)
    wfa = jnp.concatenate([w1t[:, :C1], wst[:, :C1]], axis=0)   # (cmid_pad+Cout, C1)
    wfb = jnp.concatenate([w1t[:, C1:], wst[:, C1:]], axis=0)   # (cmid_pad+Cout, C2)
    bf = jnp.concatenate([b1p, bs]).reshape(-1, 1)               # (cmid_pad+Cout, 1)
    b2c = b2.reshape(-1, 1)                                      # (Cout, 1)

    # Spatial tiling: lane-dense tiles (multiple of 128) or the full extent;
    # ragged sizes are zero-padded (padded columns are sliced off afterwards).
    if S <= tile_s:
        ts, s_pad = S, S
    else:
        ts = max(128, (tile_s // 128) * 128)
        s_pad = -(-S // ts) * ts
        if s_pad != S:
            pad = ((0, 0), (0, 0), (0, s_pad - S))
            xa = jnp.pad(xa, pad)
            xb = jnp.pad(xb, pad)

    grid = (N, s_pad // ts)
    out_flat = pl.pallas_call(
        functools.partial(_downc_conv_kernel, cmid_pad=cmid_pad),
        out_shape=jax.ShapeDtypeStruct((N, Cout, s_pad), jnp.float32),
        grid=grid,
        in_specs=[
            pl.BlockSpec((1, C1, ts), lambda n, s: (n, 0, s)),
            pl.BlockSpec((1, C2, ts), lambda n, s: (n, 0, s)),
            pl.BlockSpec((cmid_pad + Cout, C1), lambda n, s: (0, 0)),
            pl.BlockSpec((cmid_pad + Cout, C2), lambda n, s: (0, 0)),
            pl.BlockSpec((cmid_pad + Cout, 1), lambda n, s: (0, 0)),
            pl.BlockSpec((Cout, cmid_pad), lambda n, s: (0, 0)),
            pl.BlockSpec((Cout, 1), lambda n, s: (0, 0)),
        ],
        out_specs=pl.BlockSpec((1, Cout, ts), lambda n, s: (n, 0, s)),
        compiler_params=pltpu.CompilerParams(
            dimension_semantics=("parallel", "parallel"),
            vmem_limit_bytes=64 * 1024 * 1024),
    )(xa, xb, wfa, wfb, bf, w2t, b2c)

    out = out_flat[:, :, :S] if s_pad != S else out_flat
    return out.reshape(N, Cout, Dp, Hp, Wp)


# ----------------------------- reference (plain JAX) ------------------------

def downc_block_ref(x1, x2, params):
    N, C, D, H, W = x1.shape
    pooled = x1.reshape(N, C, D // 2, 2, H // 2, 2, W // 2, 2).max(axis=(3, 5, 7))
    x = jnp.concatenate([pooled, x2], axis=1)
    xcl = jnp.transpose(x, (0, 2, 3, 4, 1)).reshape(-1, x.shape[1])
    h = jnp.maximum(xcl @ params["w1"] + params["b1"], 0.0)
    y = jnp.maximum(h @ params["w2"] + params["b2"], 0.0)
    s = xcl @ params["ws"] + params["bs"]
    o = (y + s).reshape(N, x.shape[2], x.shape[3], x.shape[4], -1)
    return jnp.transpose(o, (0, 4, 1, 2, 3))


# ----------------------------- main ------------------------------------------

if __name__ == "__main__":
    # Shapes consistent with DownCBlock(in_channel1=4, in_channel2=4,
    # out_channel=8, mid_channel=16, pool_size=2)
    N, C1, C2 = 2, 4, 4
    D = H = W = 16
    Cin, Cmid, Cout = C1 + C2, 16, 8

    key = jax.random.PRNGKey(0)
    ks = jax.random.split(key, 16)

    x1 = jax.random.normal(ks[0], (N, C1, D, H, W), jnp.float32)
    x2 = jax.random.normal(ks[1], (N, C2, D // 2, H // 2, W // 2), jnp.float32)

    def bn_params(k, c):
        k1, k2, k3, k4 = jax.random.split(k, 4)
        gamma = 1.0 + 0.1 * jax.random.normal(k1, (c,), jnp.float32)
        beta = 0.1 * jax.random.normal(k2, (c,), jnp.float32)
        mean = 0.1 * jax.random.normal(k3, (c,), jnp.float32)
        var = jnp.abs(jax.random.normal(k4, (c,), jnp.float32)) + 0.5
        return gamma, beta, mean, var

    w1 = 0.2 * jax.random.normal(ks[2], (Cin, Cmid), jnp.float32)
    b1 = 0.1 * jax.random.normal(ks[3], (Cmid,), jnp.float32)
    w2 = 0.2 * jax.random.normal(ks[4], (Cmid, Cout), jnp.float32)
    b2 = 0.1 * jax.random.normal(ks[5], (Cout,), jnp.float32)
    wsk = 0.2 * jax.random.normal(ks[6], (Cin, Cout), jnp.float32)
    bsk = 0.1 * jax.random.normal(ks[7], (Cout,), jnp.float32)

    g1, be1, m1, v1 = bn_params(ks[8], Cmid)
    g2, be2, m2, v2 = bn_params(ks[9], Cout)
    gs, bes, ms, vs = bn_params(ks[10], Cout)

    w1f, b1f = fold_bn(w1, b1, g1, be1, m1, v1)
    w2f, b2f = fold_bn(w2, b2, g2, be2, m2, v2)
    wsf, bsf = fold_bn(wsk, bsk, gs, bes, ms, vs)

    params = {"w1": w1f, "b1": b1f, "w2": w2f, "b2": b2f, "ws": wsf, "bs": bsf}

    out = jax.block_until_ready(downc_block(x1, x2, params))
    ref = jax.block_until_ready(downc_block_ref(x1, x2, params))
    np.testing.assert_allclose(np.asarray(out), np.asarray(ref),
                               rtol=1e-4, atol=1e-4)

    print("KERNEL_OK")
</pallas_src>

<mosaic_0001>
module attributes {stable_mosaic.version = 11 : i64} {
  func.func @_downc_conv_kernel(%arg0: i32, %arg1: i32, %arg2: memref<1x4x512xf32, #tpu.memory_space<vmem>>, %arg3: memref<1x4x512xf32, #tpu.memory_space<vmem>>, %arg4: memref<24x4xf32, #tpu.memory_space<vmem>>, %arg5: memref<24x4xf32, #tpu.memory_space<vmem>>, %arg6: memref<24x1xf32, #tpu.memory_space<vmem>>, %arg7: memref<8x16xf32, #tpu.memory_space<vmem>>, %arg8: memref<8x1xf32, #tpu.memory_space<vmem>>, %arg9: memref<1x8x512xf32, #tpu.memory_space<vmem>>) attributes {dimension_semantics = [#tpu.dimension_semantics<parallel>, #tpu.dimension_semantics<parallel>], iteration_bounds = array<i64: 2, 1>, scalar_prefetch = 0 : i64, scratch_operands = 0 : i64, tpu.core_type = #tpu.core_type<tc>, window_params = [{transform_indices = @transform_0, window_bounds = array<i64: 1, 4, 512>}, {transform_indices = @transform_1, window_bounds = array<i64: 1, 4, 512>}, {pipeline_mode = #tpu.pipeline_mode<synchronous>, transform_indices = @transform_2, window_bounds = array<i64: 24, 4>}, {pipeline_mode = #tpu.pipeline_mode<synchronous>, transform_indices = @transform_3, window_bounds = array<i64: 24, 4>}, {pipeline_mode = #tpu.pipeline_mode<synchronous>, transform_indices = @transform_4, window_bounds = array<i64: 24, 1>}, {pipeline_mode = #tpu.pipeline_mode<synchronous>, transform_indices = @transform_5, window_bounds = array<i64: 8, 16>}, {pipeline_mode = #tpu.pipeline_mode<synchronous>, transform_indices = @transform_6, window_bounds = array<i64: 8, 1>}, {transform_indices = @transform_7, window_bounds = array<i64: 1, 8, 512>}]} {
    %c0 = arith.constant 0 : index
    %c0_0 = arith.constant 0 : index
    %c0_1 = arith.constant 0 : index
    %0 = vector.load %arg2[%c0, %c0_0, %c0_1] : memref<1x4x512xf32, #tpu.memory_space<vmem>>, vector<1x4x512xf32>
    %1 = vector.shape_cast %0 : vector<1x4x512xf32> to vector<4x512xf32>
    %c0_2 = arith.constant 0 : index
    %c0_3 = arith.constant 0 : index
    %c0_4 = arith.constant 0 : index
    %2 = vector.load %arg3[%c0_2, %c0_3, %c0_4] : memref<1x4x512xf32, #tpu.memory_space<vmem>>, vector<1x4x512xf32>
    %3 = vector.shape_cast %2 : vector<1x4x512xf32> to vector<4x512xf32>
    %c0_5 = arith.constant 0 : index
    %c0_6 = arith.constant 0 : index
    %4 = vector.load %arg4[%c0_5, %c0_6] : memref<24x4xf32, #tpu.memory_space<vmem>>, vector<24x4xf32>
    %cst = arith.constant dense<0.000000e+00> : vector<24x512xf32>
    %5 = tpu.matmul %4, %1, %cst {dimension_numbers = #tpu.dot_dimension_numbers<[1], [0], [0], [1], [0, 0, 1, 1], [], []>} : vector<24x4xf32>, vector<4x512xf32>, vector<24x512xf32> -> vector<24x512xf32>
    %c0_7 = arith.constant 0 : index
    %c0_8 = arith.constant 0 : index
    %6 = vector.load %arg5[%c0_7, %c0_8] : memref<24x4xf32, #tpu.memory_space<vmem>>, vector<24x4xf32>
    %cst_9 = arith.constant dense<0.000000e+00> : vector<24x512xf32>
    %7 = tpu.matmul %6, %3, %cst_9 {dimension_numbers = #tpu.dot_dimension_numbers<[1], [0], [0], [1], [0, 0, 1, 1], [], []>} : vector<24x4xf32>, vector<4x512xf32>, vector<24x512xf32> -> vector<24x512xf32>
    %8 = arith.addf %5, %7 : vector<24x512xf32>
    %c0_10 = arith.constant 0 : index
    %c0_11 = arith.constant 0 : index
    %9 = vector.load %arg6[%c0_10, %c0_11] : memref<24x1xf32, #tpu.memory_space<vmem>>, vector<24x1xf32>
    %10 = vector.broadcast %9 : vector<24x1xf32> to vector<24x512xf32>
    %11 = arith.addf %8, %10 : vector<24x512xf32>
    %12 = vector.extract_strided_slice %11 {offsets = [0, 0], sizes = [16, 512], strides = [1, 1]} : vector<24x512xf32> to vector<16x512xf32>
    %cst_12 = arith.constant 0.000000e+00 : f32
    %13 = vector.broadcast %cst_12 : f32 to vector<16x512xf32>
    %14 = arith.maximumf %12, %13 : vector<16x512xf32>
    %15 = vector.extract_strided_slice %11 {offsets = [16, 0], sizes = [8, 512], strides = [1, 1]} : vector<24x512xf32> to vector<8x512xf32>
    %c0_13 = arith.constant 0 : index
    %c0_14 = arith.constant 0 : index
    %16 = vector.load %arg7[%c0_13, %c0_14] : memref<8x16xf32, #tpu.memory_space<vmem>>, vector<8x16xf32>
    %cst_15 = arith.constant dense<0.000000e+00> : vector<8x512xf32>
    %17 = tpu.matmul %16, %14, %cst_15 {dimension_numbers = #tpu.dot_dimension_numbers<[1], [0], [0], [1], [0, 0, 1, 1], [], []>} : vector<8x16xf32>, vector<16x512xf32>, vector<8x512xf32> -> vector<8x512xf32>
    %c0_16 = arith.constant 0 : index
    %c0_17 = arith.constant 0 : index
    %18 = vector.load %arg8[%c0_16, %c0_17] : memref<8x1xf32, #tpu.memory_space<vmem>>, vector<8x1xf32>
    %19 = vector.broadcast %18 : vector<8x1xf32> to vector<8x512xf32>
    %20 = arith.addf %17, %19 : vector<8x512xf32>
    %cst_18 = arith.constant 0.000000e+00 : f32
    %21 = vector.broadcast %cst_18 : f32 to vector<8x512xf32>
    %22 = arith.maximumf %20, %21 : vector<8x512xf32>
    %23 = arith.addf %22, %15 : vector<8x512xf32>
    %c0_19 = arith.constant 0 : index
    %c0_20 = arith.constant 0 : index
    %c0_21 = arith.constant 0 : index
    %24 = vector.load %arg9[%c0_19, %c0_20, %c0_21] : memref<1x8x512xf32, #tpu.memory_space<vmem>>, vector<1x8x512xf32>
    %25 = vector.shape_cast %24 : vector<1x8x512xf32> to vector<8x512xf32>
    %26 = vector.shape_cast %23 : vector<8x512xf32> to vector<1x8x512xf32>
    tpu.vector_store %arg9[%c0_19, %c0_20, %c0_21], %26 {strides = array<i32>} : memref<1x8x512xf32, #tpu.memory_space<vmem>>, vector<1x8x512xf32>,
    return
  }
  func.func @transform_0(%arg0: i32, %arg1: i32) -> (i32, i32, i32) {
    %c0_i32 = arith.constant 0 : i32
    %c0_i32_0 = arith.constant 0 : i32
    return %arg0, %c0_i32, %arg1 : i32, i32, i32
  }
  func.func @transform_1(%arg0: i32, %arg1: i32) -> (i32, i32, i32) {
    %c0_i32 = arith.constant 0 : i32
    %c0_i32_0 = arith.constant 0 : i32
    return %arg0, %c0_i32, %arg1 : i32, i32, i32
  }
  func.func @transform_2(%arg0: i32, %arg1: i32) -> (i32, i32) {
    %c0_i32 = arith.constant 0 : i32
    %c0_i32_0 = arith.constant 0 : i32
    %c0_i32_1 = arith.constant 0 : i32
    return %c0_i32, %c0_i32_0 : i32, i32
  }
  func.func @transform_3(%arg0: i32, %arg1: i32) -> (i32, i32) {
    %c0_i32 = arith.constant 0 : i32
    %c0_i32_0 = arith.constant 0 : i32
    %c0_i32_1 = arith.constant 0 : i32
    return %c0_i32, %c0_i32_0 : i32, i32
  }
  func.func @transform_4(%arg0: i32, %arg1: i32) -> (i32, i32) {
    %c0_i32 = arith.constant 0 : i32
    %c0_i32_0 = arith.constant 0 : i32
    %c0_i32_1 = arith.constant 0 : i32
    return %c0_i32, %c0_i32_0 : i32, i32
  }
  func.func @transform_5(%arg0: i32, %arg1: i32) -> (i32, i32) {
    %c0_i32 = arith.constant 0 : i32
    %c0_i32_0 = arith.constant 0 : i32
    %c0_i32_1 = arith.constant 0 : i32
    return %c0_i32, %c0_i32_0 : i32, i32
  }
  func.func @transform_6(%arg0: i32, %arg1: i32) -> (i32, i32) {
    %c0_i32 = arith.constant 0 : i32
    %c0_i32_0 = arith.constant 0 : i32
    %c0_i32_1 = arith.constant 0 : i32
    return %c0_i32, %c0_i32_0 : i32, i32
  }
  func.func @transform_7(%arg0: i32, %arg1: i32) -> (i32, i32, i32) {
    %c0_i32 = arith.constant 0 : i32
    %c0_i32_0 = arith.constant 0 : i32
    return %arg0, %c0_i32, %arg1 : i32, i32, i32
  }
}

</mosaic_0001>

<bundles_post_ra>
// kernel: downc_block.1
= control target key start
LH: loop header
LB: loop body
LE: loop exit
PB: predicated region body
PF: predicated region fallthrough
CT: control target
= control target key end

     0   :  { %s2122_s0 = inlined_call_operand.hbm [shape: f32[2,4,512], index: 0, kind: input, shape index: {}]   ;;  %s2123_s1 = inlined_call_operand.hbm [shape: f32[2,4,512], index: 1, kind: input, shape index: {}]   ;;  %s2124_s2 = inlined_call_operand.hbm [shape: f32[24,4], index: 2, kind: input, shape index: {}]   ;;  %s2125_s3 = inlined_call_operand.hbm [shape: f32[24,4], index: 3, kind: input, shape index: {}]   ;;  %s2126_s4 = inlined_call_operand.hbm [shape: f32[24,1], index: 4, kind: input, shape index: {}]   ;;  %s2127_s5 = inlined_call_operand.hbm [shape: f32[8,16], index: 5, kind: input, shape index: {}]   ;;  %s2128_s6 = inlined_call_operand.hbm [shape: f32[8,1], index: 6, kind: input, shape index: {}]   ;;  %s2129_s7 = inlined_call_operand.hbm [shape: f32[2,8,512], index: 7, kind: output, shape index: {}]  }
   0x1   :  { %2136 = sst [smem:[#allocation21_spill]] %s2124_s2 }
   0x2   :  { %2137 = sst [smem:[#allocation22_spill]] %s2125_s3 }
   0x3   :  { %2138 = sst [smem:[#allocation23_spill]] %s2126_s4 }
   0x4   :  { %2139 = sst [smem:[#allocation24_spill]] %s2127_s5 }
   0x5   :  { %2140 = sst [smem:[#allocation25_spill]] %s2128_s6 }
   0x6   :  { %2141 = sst [smem:[#allocation26_spill]] %s2129_s7 }
   0x7   :  { %12 = vsyncpa [#allocation3], 0 }
   0x8   :  { %14 = vsyncpa [#allocation3 + $0x1], 0 }
   0x9   :  { %15 = vsyncpa [#allocation6], 0 }
   0xa   :  { %17 = vsyncpa [#allocation6 + $0x1], 0 }
   0xb   :  { %18 = vsyncpa [#allocation9], 0 }
   0xc   :  { %19 = vsyncpa [#allocation12], 0 }
   0xd   :  { %20 = vsyncpa [#allocation4], 0 }
   0xe   :  { %22 = vsyncpa [#allocation4 + $0x1], 0  ;;  %s1743_s24 = smov 0   ;;  %s1745_s25 = smov 0  }
   0xf   :  { %s1747_s26 = smov 0   ;;  %s1749_s27 = smov 0  }
  0x10   :  { %s1751_s28 = smov 0   ;;  %s1753_s29 = smov 0  }
  0x11 LB: > { %s1774_s30 = sadd.s32 4294967295, %s1689_s29   ;;  %p1191_p0 = scmp.ge.s32.totalorder %s1689_s29, 1  ;;  %s1689_s29 = sphi %s1753_s29, %s28_s29   ;;  %s1685_s28 = sphi %s1751_s28, %s2173_s28   ;;  %s1681_s27 = sphi %s1749_s27, %s2172_s27   ;;  %s1677_s26 = sphi %s1747_s26, %s2171_s26   ;;  %s1673_s25 = sphi %s1745_s25, %s2170_s25   ;;  %s1669_s24 = sphi %s1743_s24, %s2169_s24  }
  0x12   : > { %p2131_p1 = scmp.eq.s32.totalorder %s1774_s30, 0  ;;  %p234_p2 = scmp.lt.s32.totalorder %s1689_s29, 3 }
  0x13   : > { %s1691_s9 = smov [#allocation7]   ;;  %s1692_s12 = smov [#allocation8]  }
  0x14   : > { %p1779_p3 = pnand %p1191_p0, %p234_p2  ;;  %s246_s10 = sshll.u32 %s1691_s9, 4  ;;  %s1783_s10 = int_to_ptr.vmem [resolvable:$true] %s246_s10 }
  0x15   : > { %s259_s13 = sshll.u32 %s1692_s12, 4  ;;  %s1693_s14 = smov [#allocation11]   ;;  %s1794_s13 = int_to_ptr.vmem [resolvable:$true] %s259_s13 }
  0x16   : > { %s2142_s8 = scalar_select %p1779_p3, 1, 0 }
  0x17   : > { %p1289_p4 = pneg %p1779_p3  ;;  %s1796_s15 = sshll.u32 %s1693_s14, 4  ;;  %s287_s15 = int_to_ptr.vmem [resolvable:$true] %s1796_s15 }
  0x18   : > { %s2144_s2 = sld [smem:[#allocation21_spill]] }
  0x19   : > { %p1790_p6 = pnand %p1289_p4, %p2131_p1 }
  0x1b   : > { %p1806_p8 = pneg %p1790_p6 }
  0x1e   : > { %s1391_s18 = scalar_lea.hbm %s2144_s2, 384 }
  0x1f   : > { %p1392_p7 = scmp.ne.s32.totalorder %s2144_s2, %s1391_s18  ;;  %p1398_p11 = scmp.lt.u32.totalorder %s1391_s18, %s2144_s2 }
  0x21   : > { %p1394_p9 = pnand %p1806_p8, %p1392_p7 }
  0x23   : > { %p1395_p10 = pneg %p1394_p9 }
  0x25   : > { %p1400_p12 = pnand %p1398_p11, %p1395_p10 }
  0x27   : > { %1403 = shalt.err (!%p1400_p12)
}
  0x28   : > { %s1404_s9 = scalar_lea.vmem %s1783_s10, 384  ;;  %p1412_p4 = scmp.lt.s32.totalorder %s1783_s10, %s1783_s10 }
  0x29   : > { %p1405_p13 = scmp.ne.s32.totalorder %s1783_s10, %s1404_s9  ;;  %p1413_p5 = scmp.lt.s32.totalorder %s1404_s9, %s1404_s9 }
  0x2b   : > { %p1407_p0 = pnand %p1405_p13, %p1806_p8  ;;  %p1414_p7 = por %p1413_p5, %p1412_p4 }
  0x2d   : > { %p1408_p2 = pneg %p1407_p0 }
  0x2f   : > { %p1415_p9 = pnand %p1414_p7, %p1408_p2 }
  0x31   : > { %1418 = shalt.err (!%p1415_p9)
}
  0x32   : > { %s2133_s12 = smov 128   ;;  %s1695_s14 = smov 8  }
  0x33   : > { %1292 = dma.hbm_to_vmem [thread:$0]  (!%p1790_p6), %s2144_s2, 384, %s1783_s10, [#allocation6], %s2133_s12, %s2133_s12, %s1695_s14  }
  0x34   : > { %s2146_s3 = sld [smem:[#allocation22_spill]] }
  0x3a   : > { %s1419_s20 = scalar_lea.hbm %s2146_s3, 384 }
  0x3b   : > { %p1420_p5 = scmp.ne.s32.totalorder %s2146_s3, %s1419_s20  ;;  %p1426_p12 = scmp.lt.u32.totalorder %s1419_s20, %s2146_s3 }
  0x3d   : > { %p1422_p10 = pnand %p1420_p5, %p1806_p8 }
  0x3f   : > { %p1423_p11 = pneg %p1422_p10 }
  0x41   : > { %p1428_p13 = pnand %p1426_p12, %p1423_p11 }
  0x43   : > { %1431 = shalt.err (!%p1428_p13)
}
  0x44   : > { %s1432_s10 = scalar_lea.vmem %s1794_s13, 384  ;;  %p1440_p7 = scmp.lt.s32.totalorder %s1794_s13, %s1794_s13 }
  0x45   : > { %p1433_p0 = scmp.ne.s32.totalorder %s1794_s13, %s1432_s10  ;;  %p1441_p9 = scmp.lt.s32.totalorder %s1432_s10, %s1432_s10 }
  0x47   : > { %p1435_p2 = pnand %p1433_p0, %p1806_p8  ;;  %p1442_p5 = por %p1441_p9, %p1440_p7 }
  0x49   : > { %p1436_p4 = pneg %p1435_p2 }
  0x4b   : > { %p1443_p10 = pnand %p1442_p5, %p1436_p4 }
  0x4d   : > { %1446 = shalt.err (!%p1443_p10)
}
  0x4e   : > { %1295 = dma.hbm_to_vmem [thread:$0]  (!%p1790_p6), %s2146_s3, 384, %s1794_s13, [#allocation9], %s2133_s12, %s2133_s12, %s1695_s14  }
  0x4f   : > { %s2147_s5 = sld [smem:[#allocation24_spill]] }
  0x55   : > { %s1447_s19 = scalar_lea.hbm %s2147_s5, 128 }
  0x56   : > { %p1448_p11 = scmp.ne.s32.totalorder %s2147_s5, %s1447_s19  ;;  %p1454_p0 = scmp.lt.u32.totalorder %s1447_s19, %s2147_s5 }
  0x58   : > { %p1450_p12 = pnand %p1448_p11, %p1806_p8 }
  0x5a   : > { %p1451_p13 = pneg %p1450_p12 }
  0x5c   : > { %p1456_p2 = pnand %p1454_p0, %p1451_p13 }
  0x5e   : > { %1459 = shalt.err (!%p1456_p2)
}
  0x5f   : > { %s1460_s10 = scalar_lea.vmem %s287_s15, 128  ;;  %p1468_p5 = scmp.lt.s32.totalorder %s287_s15, %s287_s15 }
  0x60   : > { %p1461_p4 = scmp.ne.s32.totalorder %s287_s15, %s1460_s10  ;;  %p1469_p10 = scmp.lt.s32.totalorder %s1460_s10, %s1460_s10 }
  0x62   : > { %p1463_p7 = pnand %p1461_p4, %p1806_p8  ;;  %p1470_p1 = por %p1469_p10, %p1468_p5 }
  0x64   : > { %p1464_p9 = pneg %p1463_p7 }
  0x66   : > { %p1471_p3 = pnand %p1470_p1, %p1464_p9 }
  0x68   : > { %1474 = shalt.err (!%p1471_p3)
}
  0x69   : > { %1301 = dma.hbm_to_vmem [thread:$0]  (!%p1790_p6), %s2147_s5, 128, %s287_s15, [#allocation12]  }
  0x6a   : > { %s1696_s16 = smov [#allocation10]   ;;  %s1697_s18 = smov [#allocation13]  }
  0x6b   : > { %s272_s17 = sshll.u32 %s1696_s16, 4  ;;  %s297_s19 = sshll.u32 %s1697_s18, 4  ;;  %s273_s17 = int_to_ptr.vmem [resolvable:$true] %s272_s17  ;;  %s298_s19 = int_to_ptr.vmem [resolvable:$true] %s297_s19 }
  0x6c   : > { %s2148_s4 = sld [smem:[#allocation23_spill]] }
  0x72   : > { %s1475_s23 = scalar_lea.hbm %s2148_s4, 384 }
  0x73   : > { %p1476_p1 = scmp.ne.s32.totalorder %s2148_s4, %s1475_s23  ;;  %p1482_p12 = scmp.lt.u32.totalorder %s1475_s23, %s2148_s4 }
  0x75   : > { %p1478_p3 = pnand %p1476_p1, %p1806_p8 }
  0x77   : > { %p1479_p11 = pneg %p1478_p3 }
  0x79   : > { %p1484_p13 = pnand %p1482_p12, %p1479_p11 }
  0x7b   : > { %1487 = shalt.err (!%p1484_p13)
}
  0x7c   : > { %s1488_s15 = scalar_lea.vmem %s273_s17, 384  ;;  %p1496_p7 = scmp.lt.s32.totalorder %s273_s17, %s273_s17 }
  0x7d   : > { %p1489_p0 = scmp.ne.s32.totalorder %s273_s17, %s1488_s15  ;;  %p1497_p9 = scmp.lt.s32.totalorder %s1488_s15, %s1488_s15 }
  0x7f   : > { %p1491_p2 = pnand %p1489_p0, %p1806_p8  ;;  %p1498_p5 = por %p1497_p9, %p1496_p7 }
  0x81   : > { %p1492_p4 = pneg %p1491_p2 }
  0x83   : > { %p1499_p10 = pnand %p1498_p5, %p1492_p4 }
  0x85   : > { %1502 = shalt.err (!%p1499_p10)
}
  0x86   : > { %s2149_s7 = smov 128   ;;  %s2150_s6 = sld [smem:[#allocation25_spill]] }
  0x87   : > { %1298 = dma.hbm_to_vmem [thread:$0]  (!%p1790_p6), %s2148_s4, 384, %s273_s17, [#allocation9], %s2149_s7, %s2149_s7, %s1695_s14  }
  0x8c   : > { %s1503_s22 = scalar_lea.hbm %s2150_s6, 128 }
  0x8d   : > { %p1504_p1 = scmp.ne.s32.totalorder %s2150_s6, %s1503_s22  ;;  %p1510_p12 = scmp.lt.u32.totalorder %s1503_s22, %s2150_s6 }
  0x8f   : > { %p1506_p3 = pnand %p1504_p1, %p1806_p8 }
  0x91   : > { %p1507_p11 = pneg %p1506_p3 }
  0x93   : > { %p1512_p13 = pnand %p1510_p12, %p1507_p11 }
  0x95   : > { %1515 = shalt.err (!%p1512_p13)
}
  0x96   : > { %s1516_s15 = scalar_lea.vmem %s298_s19, 128  ;;  %p1524_p7 = scmp.lt.s32.totalorder %s298_s19, %s298_s19 }
  0x97   : > { %p1517_p0 = scmp.ne.s32.totalorder %s298_s19, %s1516_s15  ;;  %p1525_p9 = scmp.lt.s32.totalorder %s1516_s15, %s1516_s15 }
  0x99   : > { %p1519_p2 = pnand %p1517_p0, %p1806_p8  ;;  %p1526_p5 = por %p1525_p9, %p1524_p7 }
  0x9b   : > { %p1520_p4 = pneg %p1519_p2 }
  0x9d   : > { %p1527_p10 = pnand %p1526_p5, %p1520_p4 }
  0x9f   : > { %1530 = shalt.err (!%p1527_p10)
}
  0xa0   : > { %1304 = dma.hbm_to_vmem [thread:$0]  (!%p1790_p6), %s2150_s6, 128, %s298_s19, [#allocation12]  }
  0xa1   : > { %s1190_s21 = sadd.s32 4294967294, %s1689_s29   ;;  %s40_s7 = sadd.s32 1, %s1685_s28 }
  0xa2   : > { %s49_s11 = sadd.s32 1, %s1677_s26  ;;  %p42_p8 = scmp.ge.s32.totalorder %s40_s7, 2 }
  0xa3   : > { %p56_p1 = scmp.ne.s32.totalorder %s1677_s26, %s1673_s25  ;;  %p57_p3 = scmp.eq.s32.totalorder %s1689_s29, 0 }
  0xa4   : > { %p62_p11 = scmp.ne.s32.totalorder %s1673_s25, %s1669_s24  ;;  %s2175_s7 = smov (%p42_p8, %s40_s7), 0 }
  0xa5   : > { %p1924_p12 = por %p57_p3, %p56_p1  ;;  %p2152_p13 = scmp.eq.s32.totalorder %s1774_s30, 0 }
  0xa6   : > { %s44_s16 = ssub.s32 %s1685_s28, %s2175_s7  ;;  %p221_p0 = scmp.eq.s32.totalorder %s1774_s30, 1 }
  0xa7   : > { %p1930_p6 = por %p2152_p13, %p62_p11  ;;  %p47_p2 = scmp.eq.s32.totalorder %s44_s16, 0 }
  0xa8   : > { %p227_p4 = scmp.eq.s32.totalorder %s1190_s21, 1  ;;  %p1937_p7 = por %p221_p0, %p56_p1 }
  0xa9   : > { %s2153_s19 = scalar_select %p1930_p6, 1, 0 }
  0xaa   : > { %s2154_s18 = scalar_select %p1937_p7, 1, 0 }
  0xab   : > { %p1321_p9 = scmp.lt.s32.totalorder %s1689_s29, 2  ;;  %p1945_p5 = por %p227_p4, %p62_p11 }
  0xac   : > { %s1943_s20 = scalar_select %p47_p2, %s1677_s26, %s49_s11  }
  0xad   : > { %s2155_s22 = scalar_select %p1945_p5, 1, 0 }
  0xae   : > { %s308_s23 = sand.u32 1, %s1677_s26   ;;  %s1240_s10 = sshll.u32 %s1685_s28, 8 }
  0xaf   : > { %s1950_s9 = sshll.u32 %s308_s23, 4  ;;  %s1956_s14 = scalar_lea.hbm %s2122_s0, %s1240_s10 }
  0xb0   : > { %s312_s17 = scalar_lea.vmem [#allocation2], %s1950_s9  ;;  %p1963_p10 = pnand %p1321_p9, %p1924_p12 }
  0xb1   : > { %s322_s21 = sshll.u32 %s312_s17, 4  ;;  %s1970_s13 = scalar_lea.hbm %s2123_s1, %s1240_s10  ;;  %s1959_s21 = int_to_ptr.vmem [resolvable:$true] %s322_s21 }
  0xb2   : > { %s329_s15 = sand.u32 1, %s1689_s29   ;;  %s309_s3 = scalar_lea.sflag [#allocation3], %s308_s23 }
  0xb3   : > { %s1531_s4 = scalar_lea.hbm %s1956_s14, 256  ;;  %p1533_p1 = pneg %p1963_p10 }
  0xb4   : > { %p1532_p8 = scmp.ne.s32.totalorder %s1956_s14, %s1531_s4  ;;  %s1536_s5 = scalar_lea.hbm %s2122_s0, 512 }
  0xb5   : > { %p1537_p12 = scmp.lt.u32.totalorder %s1956_s14, %s2122_s0  ;;  %p1538_p13 = scmp.lt.u32.totalorder %s1536_s5, %s1531_s4 }
  0xb6   : > { %p1534_p3 = pnand %p1533_p1, %p1532_p8  ;;  %p1540_p2 = scmp.lt.u32.totalorder %s1531_s4, %s1956_s14 }
  0xb7   : > { %p1539_p0 = por %p1538_p13, %p1537_p12 }
  0xb8   : > { %p1535_p11 = pneg %p1534_p3 }
  0xb9   : > { %p1541_p4 = por %p1540_p2, %p1539_p0 }
  0xbb   : > { %p1542_p9 = pnand %p1541_p4, %p1535_p11 }
  0xbd   : > { %1545 = shalt.err (!%p1542_p9)
}
  0xbe   : > { %s1546_s23 = scalar_lea.vmem %s1959_s21, 256  ;;  %s1698_s10 = smov [#allocation2]  }
  0xbf   : > { %p1547_p8 = scmp.ne.s32.totalorder %s1959_s21, %s1546_s23  ;;  %s1551_s16 = sshll.u32 %s1698_s10, 4  ;;  %s1552_s16 = int_to_ptr.vmem [resolvable:$false] %s1551_s16 }
  0xc0   : > { %s1553_s6 = scalar_lea.vmem %s1552_s16, 512  ;;  %p1554_p7 = scmp.lt.s32.totalorder %s1959_s21, %s1552_s16 }
  0xc1   : > { %p1549_p3 = pnand %p1547_p8, %p1533_p1  ;;  %p1555_p12 = scmp.lt.s32.totalorder %s1553_s6, %s1546_s23 }
  0xc3   : > { %p1550_p5 = pneg %p1549_p3  ;;  %p1556_p13 = por %p1555_p12, %p1554_p7 }
  0xc5   : > { %p1557_p0 = pnand %p1556_p13, %p1550_p5 }
  0xc7   : > { %1560 = shalt.err (!%p1557_p0)
}
  0xc8   : > { %1308 = dma.hbm_to_vmem [thread:$0]  (!%p1963_p10), %s1956_s14, 256, %s1959_s21, %s309_s3  }
  0xc9   : > { %s333_s4 = scalar_lea.vmem [#allocation5], %s1950_s9  ;;  %s330_s12 = scalar_lea.sflag [#allocation6], %s329_s15 }
  0xca   : > { %s343_s5 = sshll.u32 %s333_s4, 4  ;;  %s1561_s17 = scalar_lea.hbm %s1970_s13, 256  ;;  %s344_s5 = int_to_ptr.vmem [resolvable:$true] %s343_s5 }
  0xcb   : > { %p1562_p7 = scmp.ne.s32.totalorder %s1970_s13, %s1561_s17  ;;  %s1566_s10 = scalar_lea.hbm %s2123_s1, 512 }
  0xcc   : > { %p1567_p2 = scmp.lt.u32.totalorder %s1970_s13, %s2123_s1  ;;  %p1568_p4 = scmp.lt.u32.totalorder %s1566_s10, %s1561_s17 }
  0xcd   : > { %p1564_p5 = pnand %p1562_p7, %p1533_p1  ;;  %p1570_p8 = scmp.lt.u32.totalorder %s1561_s17, %s1970_s13 }
  0xce   : > { %p1569_p9 = por %p1568_p4, %p1567_p2 }
  0xcf   : > { %p1565_p11 = pneg %p1564_p5 }
  0xd0   : > { %p1571_p3 = por %p1570_p8, %p1569_p9 }
  0xd2   : > { %p1572_p12 = pnand %p1571_p3, %p1565_p11 }
  0xd4   : > { %1575 = shalt.err (!%p1572_p12)
}
  0xd5   : > { %s1576_s3 = scalar_lea.vmem %s344_s5, 256  ;;  %s1699_s9 = smov [#allocation5]  }
  0xd6   : > { %p1577_p13 = scmp.ne.s32.totalorder %s344_s5, %s1576_s3  ;;  %s1581_s14 = sshll.u32 %s1699_s9, 4  ;;  %s1582_s14 = int_to_ptr.vmem [resolvable:$false] %s1581_s14 }
  0xd7   : > { %s1583_s21 = scalar_lea.vmem %s1582_s14, 512  ;;  %p1584_p5 = scmp.lt.s32.totalorder %s344_s5, %s1582_s14 }
  0xd8   : > { %p1579_p0 = pnand %p1577_p13, %p1533_p1  ;;  %p1585_p6 = scmp.lt.s32.totalorder %s1583_s21, %s1576_s3 }
  0xda   : > { %p1580_p7 = pneg %p1579_p0  ;;  %p1586_p2 = por %p1585_p6, %p1584_p5 }
  0xdc   : > { %p1587_p4 = pnand %p1586_p2, %p1580_p7 }
  0xde   : > { %1590 = shalt.err (!%p1587_p4)
}
  0xdf   : > { %1311 = dma.hbm_to_vmem [thread:$0]  (!%p1963_p10), %s1970_s13, 256, %s344_s5, %s330_s12  }
  0xe0   : > { %p2157_p11 = scmp.ne.s32.totalorder %s2142_s8, 0 }
  0xe1   : > { %s2023_s15 = sand.u32 (!%p2157_p11), 1, %s1673_s25   ;;  %p2158_p1 = scmp.ne.s32.totalorder (!%p2157_p11), %s2153_s19, 0 }
  0xe2   : > { %352 = sbr.rel (%p2157_p11) target bundleno = 723 (0x2d3), region = 48  ;;  %s1205_s4 = sshll.u32 (!%p2157_p11), %s2023_s15, 4 }
  0xe3   : > { %s355_s17 = scalar_lea.sflag (!%p2157_p11), [#allocation3], %s2023_s15  ;;  %s358_s2 = scalar_lea.vmem (!%p2157_p11), [#allocation2], %s1205_s4 }
  0xe9   : > { %1644 = dma.done.wait (%p2158_p1), %s355_s17, 256  }
  0xea   : > { %1646 = vsyncadd (%p2158_p1), %s355_s17, 4294967040  ;;  %s363_s11 = sand.u32 1, %s1774_s30   ;;  %s367_s8 = scalar_lea.vmem [#allocation5], %s1205_s4 }
  0xeb   : > { %s364_s13 = scalar_lea.sflag [#allocation6], %s363_s11 }
  0xec   : > { %1648 = dma.done.wait (%p2158_p1), %s364_s13, 256  }
  0xed   : > { %1650 = vsyncadd (%p2158_p1), %s364_s13, 4294967040  ;;  %p2159_p6 = scmp.eq.s32.totalorder %s1774_s30, 0 }
  0xef   : > { %1652 = dma.done.wait (%p2159_p6), [#allocation6], 384   ;;  %p2160_p10 = pmov %p2159_p6 }
  0xf0   : > { %p2161_p9 = pmov %p2159_p6 }
  0xf1   : > { %1654 = vsyncadd (%p2160_p10), [#allocation6], 4294966912 }
  0xf2   : > { %1656 = dma.done.wait (%p2161_p9), [#allocation9], 768   ;;  %p2162_p8 = pmov %p2159_p6 }
  0xf3   : > { %p2163_p3 = pmov %p2159_p6 }
  0xf4   : > { %1658 = vsyncadd (%p2162_p8), [#allocation9], 4294966528 }
  0xf5   : > { %1660 = dma.done.wait (%p2163_p3), [#allocation12], 256   ;;  %p2164_p12 = pmov %p2163_p3 }
  0xf6   : > { %v1700_v0 = vmov 0.0   ;;  %v1701_v1 = vmov 0   ;;  %v428_v2 = vld [vmem:[%s367_s8] sm:$0xff]  ;;  %vm450_vm0 = vcmask 1043456   ;;  %v429_v3 = vld [vmem:[%s367_s8 + $0x8] sm:$0xff]  ;;  %vm440_vm1 = vcmask 31744  }
  0xf7   : > { %1662 = vsyncadd (%p2164_p12), [#allocation12], 4294967040  ;;  %523 = vmatprep.mubr.f32.mxu0 %v1700_v0  ;;  %606 = vmatprep.mubr.f32.mxu1 %v1700_v0  ;;  %v438_v4 = vcombine.high %v428_v2, %v428_v2  ;;  %v439_v5 = vcombine.high %v429_v3, %v429_v3  ;;  %v426_v6 = vld [vmem:[%s358_s2] sm:$0xff]  ;;  %v433_v7 = vld [vmem:[#allocation8] sm:$0xff]  ;;  %vm857_vm2 = vcmask 130048   ;;  %s1212_s30 = sshll.u32 %s2023_s15, 5 }
  0xf8   : > { %1385 = vset.pattern.permute.xlu0 %v1701_v1  ;;  %1386 = vset.pattern.permute.xlu1 %v1701_v1  ;;  %v427_v8 = vld [vmem:[%s358_s2 + $0x8] sm:$0xff]  ;;  %v627_v9 = vcombine.high %v426_v6, %v426_v6  ;;  %v434_v11 = vld [vmem:[#allocation8 + $0x8] sm:$0xff]  ;;  %v812_v12 = vld [vmem:[#allocation10] sm:$0xff]  ;;  %s1242_s19 = sshll.u32 %s1681_s27, 9  ;;  %s422_s5 = scalar_lea.vmem [#allocation14], %s1212_s30 }
  0xf9   : > { %1213 = vmatprep.subr.msk.mxu0 %vm450_vm0, %v438_v4  ;;  %1218 = vmatprep.subr.msk.mxu1 %vm450_vm0, %v439_v5  ;;  %v628_v10 = vcombine.high %v427_v8, %v427_v8  ;;  %v851_v13 = vld [vmem:[#allocation13] sm:$0xff]  ;;  %v435_v14 = vld [vmem:[#allocation8 + $0x10] sm:$0xff]  ;;  %v813_v15 = vld [vmem:[#allocation10 + $0x8] sm:$0xff]  ;;  %s1032_s12 = sshll.u32 %s422_s5, 4  ;;  %s2165_s16 = sld [smem:[#allocation26_spill]]  ;;  %s2075_s12 = int_to_ptr.vmem [resolvable:$true] %s1032_s12 }
  0xfa   : > { %1214 = vmatpush1.msk.msra.mxu0 %vm450_vm0, %v428_v2  ;;  %1219 = vmatpush1.msk.msra.mxu1 %vm450_vm0, %v429_v3  ;;  %v814_v16 = vld [vmem:[#allocation10 + $0x10] sm:$0xff]  ;;  %v431_v18 = vld [vmem:[#allocation7 + $0x8] sm:$0xff]  ;;  %v432_v19 = vld [vmem:[#allocation7 + $0x10] sm:$0xff]  ;;  %s1016_s27 = scalar_lea.sflag [#allocation4], %s2023_s15  ;;  %s1591_s3 = scalar_lea.vmem %s2075_s12, 512 }
  0xfb   : > { %1215 = vmatmul.mubr.msk.f32.vlgmr.msra.gmra.mrb[0].mxu0 %vm440_vm1, %v433_v7  ;;  %1220 = vmatmul.mubr.msk.f32.vlgmr.msra.gmra.mrb[0].mxu1 %vm440_vm1, %v433_v7  ;;  %v430_v17 = vld [vmem:[#allocation7] sm:$0xff]  ;;  %v850_v54 = vld [vmem:[#allocation11] sm:$0xff]  ;;  %p1592_p13 = scmp.ne.s32.totalorder %s2075_s12, %s1591_s3  ;;  %p2166_p0 = scmp.ne.s32.totalorder %s2154_s18, 0 }
  0xfc   : > { %529 = vmatprep.mubr.f32.mxu0 %v1700_v0  ;;  %612 = vmatprep.mubr.f32.mxu1 %v1700_v0  ;;  %s1702_s9 = smov [#allocation14]  }
  0xfd   : > { %1223 = vmatprep.subr.msk.mxu0 %vm450_vm0, %v627_v9  ;;  %1228 = vmatprep.subr.msk.mxu1 %vm450_vm0, %v628_v10  ;;  %p1593_p7 = pnand %p1592_p13, %p2166_p0  ;;  %s1595_s14 = sshll.u32 %s1702_s9, 4  ;;  %s1596_s14 = int_to_ptr.vmem [resolvable:$false] %s1595_s14 }
  0xfe   : > { %1224 = vmatpush1.msk.msra.mxu0 %vm450_vm0, %v426_v6  ;;  %1229 = vmatpush1.msk.msra.mxu1 %vm450_vm0, %v427_v8  ;;  %s1597_s21 = scalar_lea.vmem %s1596_s14, 1024  ;;  %p1598_p2 = scmp.lt.s32.totalorder %s2075_s12, %s1596_s14 }
  0xff   : > { %1216 = vmatmul.mubr.msk.f32.gmra.mrb[2].mxu0 %vm440_vm1, %v434_v11  ;;  %1221 = vmatmul.mubr.msk.f32.gmra.mrb[2].mxu1 %vm440_vm1, %v434_v11  ;;  %s2073_s6 = scalar_lea.hbm %s2165_s16, %s1242_s19  ;;  %p1594_p5 = pneg %p1593_p7 }
 0x100   : > { %535 = vmatprep.mubr.f32.mxu0 %v1700_v0  ;;  %618 = vmatprep.mubr.f32.mxu1 %v1700_v0  ;;  %p1599_p4 = scmp.lt.s32.totalorder %s1597_s21, %s1591_s3 }
 0x101   : > { %817 = vperm.xlu0 %1385, %v812_v12   ;;  %854 = vperm.xlu1 %1386, %v851_v13  }
 0x102   : > { %p1600_p11 = por %p1599_p4, %p1598_p2 }
 0x103   : > { %1217 = vmatmul.mubr.msk.f32.gmra.mrb[4].mxu0 %vm440_vm1, %v435_v14  ;;  %1222 = vmatmul.mubr.msk.f32.gmra.mrb[4].mxu1 %vm440_vm1, %v435_v14 }
 0x104   : > { %710 = vmatprep.mubr.f32.mxu0 %v1700_v0  ;;  %793 = vmatprep.mubr.f32.mxu1 %v1700_v0  ;;  %p1601_p1 = pnand %p1600_p11, %p1594_p5 }
 0x105   : > { %822 = vperm.xlu0 %1385, %v813_v15   ;;  %827 = vperm.xlu1 %1386, %v814_v16  }
 0x107   : > { %1225 = vmatmul.mubr.msk.f32.vlgmr.msra.gmra.mrb[0].mxu0 %vm440_vm1, %v430_v17  ;;  %1230 = vmatmul.mubr.msk.f32.vlgmr.msra.gmra.mrb[0].mxu1 %vm440_vm1, %v430_v17 }
 0x108   : > { %716 = vmatprep.mubr.f32.mxu0 %v1700_v0  ;;  %799 = vmatprep.mubr.f32.mxu1 %v1700_v0 }
 0x10b   : > { %1226 = vmatmul.mubr.msk.f32.gmra.mrb[2].mxu0 %vm440_vm1, %v431_v18  ;;  %1231 = vmatmul.mubr.msk.f32.gmra.mrb[2].mxu1 %vm440_vm1, %v431_v18 }
 0x10c   : > { %722 = vmatprep.mubr.f32.mxu0 %v1700_v0  ;;  %805 = vmatprep.mubr.f32.mxu1 %v1700_v0 }
 0x10f   : > { %1227 = vmatmul.mubr.msk.f32.gmra.mrb[4].mxu0 %vm440_vm1, %v432_v19  ;;  %1232 = vmatmul.mubr.msk.f32.gmra.mrb[4].mxu1 %vm440_vm1, %v432_v19 }
 0x110   : > { %925 = vmatprep.mubr.f32.mxu0 %v1700_v0  ;;  %996 = vmatprep.mubr.f32.mxu1 %v1700_v0 }
 0x180   : > { %v818_v20 = vpop.permute.xlu0 %817  ;;  %v855_v55 = vpop.permute.xlu1 %854 }
 0x184   : > { %v823_v27 = vpop.permute.xlu0 %822  ;;  %v828_v56 = vpop.permute.xlu1 %827 }
 0x1da   : > { %v712_v21 = vpop.f32.mrb[0].mxu0  ;;  %v795_v22 = vpop.f32.mrb[0].mxu1 }
 0x1db   : > { %v714_v23 = vpop.f32.mrb[1].mxu0  ;;  %v797_v24 = vpop.f32.mrb[1].mxu1  ;;  %v830_v25 = vadd.f32 %v818_v20, %v712_v21  ;;  %v832_v26 = vadd.f32 %v818_v20, %v795_v22 }
 0x1dc   : > { %v831_v28 = vadd.f32 %v818_v20, %v714_v23  ;;  %v833_v29 = vadd.f32 %v818_v20, %v797_v24 }
 0x1dd   : > { %v842_v38 = vmax.f32 %v830_v25, 0.0  ;;  %v844_v39 = vmax.f32 %v832_v26, 0.0 }
 0x1de   : > { %v718_v30 = vpop.f32.mrb[2].mxu0  ;;  %v801_v31 = vpop.f32.mrb[2].mxu1  ;;  %v843_v42 = vmax.f32 %v831_v28, 0.0  ;;  %v845_v43 = vmax.f32 %v833_v29, 0.0 }
 0x1df   : > { %v834_v32 = vadd.f32 %v823_v27, %v718_v30  ;;  %v836_v33 = vadd.f32 %v823_v27, %v801_v31  ;;  %v720_v34 = vpop.f32.mrb[3].mxu0  ;;  %v803_v35 = vpop.f32.mrb[3].mxu1 }
 0x1e0   : > { %v835_v36 = vadd.f32 %v823_v27, %v720_v34  ;;  %v837_v37 = vadd.f32 %v823_v27, %v803_v35 }
 0x1e1   : > { %v846_v40 = vmax.f32 %v834_v32, 0.0  ;;  %v848_v41 = vmax.f32 %v836_v33, 0.0 }
 0x1e2   : > { %v847_v44 = vmax.f32 %v835_v36, 0.0  ;;  %v849_v45 = vmax.f32 %v837_v37, 0.0  ;;  %v724_v46 = vpop.f32.mrb[4].mxu0  ;;  %v807_v47 = vpop.f32.mrb[4].mxu1 }
 0x1e3   : > { %v1245_v48 = vpack.c.bf16 %v846_v40, %v842_v38  ;;  %v1249_v49 = vpack.c.bf16 %v848_v41, %v844_v39  ;;  %v726_v50 = vpop.f32.mrb[5].mxu0  ;;  %v809_v51 = vpop.f32.mrb[5].mxu1  ;;  %v838_v1 = vadd.f32 %v828_v56, %v724_v46  ;;  %v840_v2 = vadd.f32 %v828_v56, %v807_v47 }
 0x1e4   : > { %v1243_v52 = vpack.c.bf16 %v847_v44, %v843_v42  ;;  %v1247_v53 = vpack.c.bf16 %v849_v45, %v845_v43  ;;  %v839_v5 = vadd.f32 %v828_v56, %v726_v50  ;;  %v841_v6 = vadd.f32 %v828_v56, %v809_v51 }
 0x1e6   : > { %1244 = vmatprep.subr.bf16.mxu0 %v1243_v52  ;;  %1248 = vmatprep.subr.bf16.mxu1 %v1247_v53 }
 0x1e7   : > { %1246 = vmatpush1.bf16.msra.mxu0 %v1245_v48  ;;  %1250 = vmatpush1.bf16.msra.mxu1 %v1249_v49 }
 0x1ea   : > { %1233 = vmatmul.mubr.msk.f32.vlgmr.msra.gmra.mrb[6].mxu0 %vm857_vm2, %v850_v54  ;;  %1234 = vmatmul.mubr.msk.f32.vlgmr.msra.gmra.mrb[6].mxu1 %vm857_vm2, %v850_v54 }
 0x2bd   : > { %v927_v57 = vpop.f32.mrb[6].mxu0  ;;  %v998_v58 = vpop.f32.mrb[6].mxu1 }
 0x2be   : > { %v928_v59 = vadd.f32 %v927_v57, %v855_v55  ;;  %v999_v60 = vadd.f32 %v998_v58, %v855_v55  ;;  %v929_v61 = vpop.f32.mrb[7].mxu0  ;;  %v1000_v62 = vpop.f32.mrb[7].mxu1 }
 0x2bf   : > { %v930_v63 = vadd.f32 %v929_v61, %v855_v55  ;;  %v1001_v0 = vadd.f32 %v1000_v62, %v855_v55 }
 0x2c0   : > { %v1003_v3 = vmax.f32 %v928_v59, 0.0  ;;  %v1005_v4 = vmax.f32 %v999_v60, 0.0 }
 0x2c1   : > { %v1004_v7 = vmax.f32 %v930_v63, 0.0  ;;  %v1006_v8 = vmax.f32 %v1001_v0, 0.0 }
 0x2c2   : > { %v1007_v9 = vadd.f32 %v1003_v3, %v838_v1  ;;  %v1009_v10 = vadd.f32 %v1005_v4, %v840_v2 }
 0x2c3   : > { %v1008_v11 = vadd.f32 %v1004_v7, %v839_v5  ;;  %v1010_v12 = vadd.f32 %v1006_v8, %v841_v6 }
 0x2c4   : > { %1011 = vst [vmem:[%s422_s5] sm:$0xff] %v1007_v9  ;;  %1013 = vst [vmem:[%s422_s5 + $0x10] sm:$0xff] %v1009_v10 }
 0x2c5   : > { %1012 = vst [vmem:[%s422_s5 + $0x8] sm:$0xff] %v1008_v11  ;;  %1014 = vst [vmem:[%s422_s5 + $0x18] sm:$0xff] %v1010_v12 }
 0x2c6   : > { %1604 = shalt.err (!%p1601_p1)
}
 0x2c7   : > { %s1605_s15 = scalar_lea.hbm %s2073_s6, 512  ;;  %s1609_s2 = scalar_lea.hbm %s2165_s16, 1024 }
 0x2c8   : > { %p1606_p6 = scmp.ne.s32.totalorder %s2073_s6, %s1605_s15  ;;  %p1610_p8 = scmp.lt.u32.totalorder %s2073_s6, %s2165_s16 }
 0x2c9   : > { %p1611_p3 = scmp.lt.u32.totalorder %s1609_s2, %s1605_s15  ;;  %p1613_p13 = scmp.lt.u32.totalorder %s1605_s15, %s2073_s6 }
 0x2ca   : > { %p1607_p10 = pnand %p1606_p6, %p2166_p0 }
 0x2cb   : > { %p1612_p12 = por %p1611_p3, %p1610_p8 }
 0x2cc   : > { %p1608_p9 = pneg %p1607_p10 }
 0x2cd   : > { %p1614_p7 = por %p1613_p13, %p1612_p12 }
 0x2cf   : > { %p1615_p5 = pnand %p1614_p7, %p1608_p9 }
 0x2d1   : > { %1618 = shalt.err (!%p1615_p5)
}
 0x2d2   : > { %1287 = dma.vmem_to_hbm [thread:$0]  (%p2166_p0), %s2075_s12, 512, %s2073_s6, %s1016_s27  }
 0x2d3 PF: > { %s1044_s8 = sand.u32 1, %s1669_s24   ;;  %p2167_p2 = scmp.ne.s32.totalorder %s2155_s22, 0 }
 0x2d4   : > { %p2168_p4 = scmp.ge.s32.totalorder %s1689_s29, 2  ;;  %s1045_s30 = scalar_lea.sflag [#allocation4], %s1044_s8 }
 0x2d6   : > { %p1313_p11 = pnand %p2168_p4, %p2167_p2 }
 0x2d8   : > { %1664 = dma.done.wait (!%p1313_p11), %s1045_s30, 512  }
 0x2d9   : > { %1666 = vsyncadd (!%p1313_p11), %s1045_s30, 4294966784  ;;  %s28_s29 = sadd.s32 1, %s1689_s29   ;;  %s2169_s24 = smov %s1673_s25 }
 0x2da   : > { %p25_p1 = scmp.ge.s32.totalorder %s28_s29, 4   ;;  %s2170_s25 = smov %s1677_s26 }
 0x2db   : > { %s2171_s26 = smov %s1943_s20  ;;  %s2172_s27 = smov %s1685_s28 }
 0x2dc   : > { %s2173_s28 = smov %s2175_s7  ;;  %27 = sbr.rel (!%p25_p1) target bundleno = 17 (0x11), region = 126 }
 0x2e3   :  { %1050 = vsyncpa [#allocation3], 1 }
 0x2e4   :  { %1052 = vsyncpa [#allocation3 + $0x1], 1 }
 0x2e5   :  { %1053 = vsyncpa [#allocation6], 1 }
 0x2e6   :  { %1055 = vsyncpa [#allocation6 + $0x1], 1 }
 0x2e7   :  { %1056 = vsyncpa [#allocation9], 1 }
 0x2e8   :  { %1057 = vsyncpa [#allocation12], 1 }
 0x2e9   :  { %1058 = vsyncpa [#allocation4], 1 }
 0x2ea   :  { %1060 = vsyncpa [#allocation4 + $0x1], 1 }

</bundles_post_ra>
